<compile_context>
chip_gen: v5e
topology: v5e:2x2
jax: 0.10.0
libtpu: 0.0.40
codegen_flags: <defaults>
</compile_context>

<pallas_src>
import jax
import jax.numpy as jnp
from jax.experimental import pallas as pl
from jax.experimental.pallas import tpu as pltpu


def _round_up(x, m):
    return ((x + m - 1) // m) * m


def _cdiv(a, b):
    return (a + b - 1) // b


def _vmem_capacity_bytes():
    try:
        info = pltpu.get_tpu_info()
        cap = getattr(info, "vmem_capacity_bytes", None)
        if cap:
            return int(cap)
    except Exception:
        pass
    return 64 * 1024 * 1024  # conservative fallback (v7x per-TC physical VMEM)


def _dynamics_kernel(g_ref, wt_ref, o_ref):
    # o[n, j] = sum_k g[n, k] * W^T[k, j]  ==  (g @ W^T)[n, j]
    o_ref[...] = jnp.dot(
        g_ref[...], wt_ref[...], preferred_element_type=jnp.float32
    ).astype(o_ref.dtype)


def dynamics_forward(g, weight, *, force_pallas=False):
    """Pallas equivalent of `dynamics.forward`: y = g @ weight^T (no bias).

    g:      [..., G]  input Koopman states
    weight: [G, G]    nn.Linear weight (no bias)
    """
    orig_shape = g.shape
    G = orig_shape[-1]
    out_dtype = jnp.promote_types(g.dtype, weight.dtype)
    itemsize = jnp.dtype(out_dtype).itemsize

    g2d = g.reshape(-1, G).astype(out_dtype)
    w = weight.astype(out_dtype)
    N = g2d.shape[0]

    LANE = 128
    SUBLANE = 8 if itemsize >= 4 else (16 if itemsize == 2 else 32)
    Gp = _round_up(max(G, LANE), LANE)

    # Small-problem bailout: XLA fusion is strictly faster at these sizes.
    if N == 0 or (not force_pallas and N * Gp * itemsize < (1 << 20)):
        out = jax.lax.dot_general(
            g2d, w, (((1,), (1,)), ((), ())), preferred_element_type=jnp.float32
        ).astype(out_dtype)
        return out.reshape(orig_shape)

    # One-time wrapper prep of the weight (amortized over all row tiles):
    # transpose so the kernel contracts (1,0) with no per-step transpose, and
    # zero-pad ONLY its output dim to Gp so output stores stay lane-dense.
    wt = w.T  # (G, G)
    if Gp != G:
        wt = jnp.pad(wt, ((0, 0), (0, Gp - G)))  # (G, Gp), mathematically exact

    vmem_cap = _vmem_capacity_bytes()
    budget = int(0.6 * vmem_cap)  # ~38 MiB on v7x, ~77 MiB on v5e/v6e

    # Weight handling: keep W^T fully resident (single-buffered, constant
    # index_map) when it fits; otherwise tile its output dim with a second
    # grid axis instead of collapsing tm (v7x 64-MiB break point for large G).
    w_total = G * Gp * itemsize
    if w_total <= budget // 2:
        tn = Gp
        w_vmem = w_total  # single buffer only
        w_spec = pl.BlockSpec(
            (G, tn), lambda i, j: (0, 0), pipeline_mode=pl.Buffered(1)
        )
    else:
        tn = ((budget // 3) // (2 * G * itemsize)) // LANE * LANE
        tn = max(LANE, min(tn, Gp))
        w_vmem = 2 * G * tn * itemsize  # default double-buffered
        w_spec = pl.BlockSpec((G, tn), lambda i, j: (0, j))
    cols = _cdiv(Gp, tn)

    # Row tile: fill the remaining budget (2x streamed g tile + 2x out tile).
    per_row = itemsize * (2 * G + 2 * tn)
    tm = min(1024, max(SUBLANE, (budget - w_vmem) // per_row))
    tm = max(SUBLANE, (tm // SUBLANE) * SUBLANE)
    tm = min(tm, _round_up(N, SUBLANE))
    # Ensure >= 2 total grid steps so the v7x megacore shards across both TCs.
    if cols * _cdiv(N, tm) < 2 and N > SUBLANE:
        tm = max(SUBLANE, _round_up(_cdiv(N, 2), SUBLANE))
    rows = _cdiv(N, tm)

    vmem_need = w_vmem + tm * per_row
    vmem_limit = int(min(max(2 * vmem_need, 32 << 20), int(0.85 * vmem_cap)))

    cost = pl.CostEstimate(
        flops=2 * N * G * Gp,
        transcendentals=0,
        bytes_accessed=itemsize * (N * G + G * Gp + N * Gp),
    )

    out = pl.pallas_call(
        _dynamics_kernel,
        out_shape=jax.ShapeDtypeStruct((N, Gp), out_dtype),
        grid=(rows, cols),
        in_specs=[
            # Streamed row tiles of g at its natural last dim (no lane
            # inflation); block index constant over j -> resident across cols.
            # (If a profile shows exposed DMA on v7x, sweep pl.Buffered(3) here.)
            pl.BlockSpec((tm, G), lambda i, j: (i, 0)),
            w_spec,
        ],
        out_specs=pl.BlockSpec((tm, tn), lambda i, j: (i, j)),
        compiler_params=pltpu.CompilerParams(
            dimension_semantics=("parallel", "parallel"),
            vmem_limit_bytes=vmem_limit,
        ),
        cost_estimate=cost,
    )(g2d, wt)

    if Gp != G:
        out = out[:, :G]
    return out.reshape(orig_shape)


def init_dynamics_params(g_dim, dtype=jnp.float32):
    # Matches: self.dynamics.weight.data = zeros_like(...) + 0.001
    return jnp.zeros((g_dim, g_dim), dtype=dtype) + 0.001


if __name__ == "__main__":
    key = jax.random.PRNGKey(0)
    B, S, G = 2, 8, 32  # batch, objects/seq, Koopman embedding size
    g_in = jax.random.normal(key, (B, S, G), dtype=jnp.float32)
    weight = init_dynamics_params(G)

    # Reference (y = g @ W^T) in plain JAX.
    ref = jnp.einsum("bsg,hg->bsh", g_in, weight)

    # Force the Pallas path so the kernel itself is compiled and exercised.
    out = dynamics_forward(g_in, weight, force_pallas=True)
    out = jax.block_until_ready(out)
    assert out.shape == (B, S, G)
    assert jnp.allclose(out, ref, atol=1e-5, rtol=1e-5)

    # Default path (small-problem bailout -> plain XLA) must agree as well.
    out2 = jax.block_until_ready(dynamics_forward(g_in, weight))
    assert jnp.allclose(out2, ref, atol=1e-5, rtol=1e-5)

    print("KERNEL_OK")
</pallas_src>

<mosaic_0001>
module attributes {stable_mosaic.version = 11 : i64} {
  func.func @_dynamics_kernel(%arg0: i32, %arg1: i32, %arg2: memref<8x32xf32, #tpu.memory_space<vmem>>, %arg3: memref<32x128xf32, #tpu.memory_space<vmem>>, %arg4: memref<8x128xf32, #tpu.memory_space<vmem>>) attributes {dimension_semantics = [#tpu.dimension_semantics<parallel>, #tpu.dimension_semantics<parallel>], iteration_bounds = array<i64: 2, 1>, scalar_prefetch = 0 : i64, scratch_operands = 0 : i64, tpu.core_type = #tpu.core_type<tc>, window_params = [{transform_indices = @transform_0, window_bounds = array<i64: 8, 32>}, {pipeline_mode = #tpu.pipeline_mode<synchronous>, transform_indices = @transform_1, window_bounds = array<i64: 32, 128>}, {transform_indices = @transform_2, window_bounds = array<i64: 8, 128>}]} {
    %c0 = arith.constant 0 : index
    %c0_0 = arith.constant 0 : index
    %0 = vector.load %arg2[%c0, %c0_0] : memref<8x32xf32, #tpu.memory_space<vmem>>, vector<8x32xf32>
    %c0_1 = arith.constant 0 : index
    %c0_2 = arith.constant 0 : index
    %1 = vector.load %arg3[%c0_1, %c0_2] : memref<32x128xf32, #tpu.memory_space<vmem>>, vector<32x128xf32>
    %cst = arith.constant dense<0.000000e+00> : vector<8x128xf32>
    %2 = tpu.matmul %0, %1, %cst {dimension_numbers = #tpu.dot_dimension_numbers<[1], [0], [0], [1], [0, 0, 1, 1], [], []>} : vector<8x32xf32>, vector<32x128xf32>, vector<8x128xf32> -> vector<8x128xf32>
    %c0_3 = arith.constant 0 : index
    %c0_4 = arith.constant 0 : index
    %3 = vector.load %arg4[%c0_3, %c0_4] : memref<8x128xf32, #tpu.memory_space<vmem>>, vector<8x128xf32>
    tpu.vector_store %arg4[%c0_3, %c0_4], %2 {strides = array<i32>} : memref<8x128xf32, #tpu.memory_space<vmem>>, vector<8x128xf32>,
    return
  }
  func.func @transform_0(%arg0: i32, %arg1: i32) -> (i32, i32) {
    %c0_i32 = arith.constant 0 : i32
    %c0_i32_0 = arith.constant 0 : i32
    return %arg0, %c0_i32 : i32, i32
  }
  func.func @transform_1(%arg0: i32, %arg1: i32) -> (i32, i32) {
    %c0_i32 = arith.constant 0 : i32
    %c0_i32_0 = arith.constant 0 : i32
    %c0_i32_1 = arith.constant 0 : i32
    return %c0_i32, %c0_i32_0 : i32, i32
  }
  func.func @transform_2(%arg0: i32, %arg1: i32) -> (i32, i32) {
    %c0_i32 = arith.constant 0 : i32
    return %arg0, %arg1 : i32, i32
  }
}

</mosaic_0001>

<bundles_post_ra>
// kernel: tpu_custom_call.1
= control target key start
LH: loop header
LB: loop body
LE: loop exit
PB: predicated region body
PF: predicated region fallthrough
CT: control target
= control target key end

     0   :  { %7 = vsyncpa [#allocation3], 0  ;;  %s728_s0 = inlined_call_operand.hbm [shape: f32[16,32], index: 0, kind: input, shape index: {}]   ;;  %s729_s1 = inlined_call_operand.hbm [shape: f32[32,128], index: 1, kind: input, shape index: {}]   ;;  %s730_s2 = inlined_call_operand.hbm [shape: f32[16,128], index: 2, kind: output, shape index: {}]  }
   0x1   :  { %9 = vsyncpa [#allocation3 + $0x1], 0 }
   0x2   :  { %10 = vsyncpa [#allocation6], 0 }
   0x3   :  { %11 = vsyncpa [#allocation4], 0 }
   0x4   :  { %13 = vsyncpa [#allocation4 + $0x1], 0  ;;  %s585_s9 = smov 0   ;;  %s587_s10 = smov 0  }
   0x5   :  { %s589_s11 = smov 0   ;;  %s591_s12 = smov 0  }
   0x6   :  { %s593_s13 = smov 0   ;;  %s595_s14 = smov 0  }
   0x7 LB: > { %s328_s15 = sadd.s32 4294967295, %s565_s14   ;;  %p330_p0 = scmp.ge.s32.totalorder %s565_s14, 1  ;;  %s565_s14 = sphi %s595_s14, %s19_s14   ;;  %s561_s13 = sphi %s593_s13, %s741_s13   ;;  %s557_s12 = sphi %s591_s12, %s740_s12   ;;  %s553_s11 = sphi %s589_s11, %s739_s11   ;;  %s549_s10 = sphi %s587_s10, %s738_s10   ;;  %s545_s9 = sphi %s585_s9, %s737_s9  }
   0x8   : > { %p617_p1 = scmp.eq.s32.totalorder %s328_s15, 0  ;;  %p111_p2 = scmp.lt.s32.totalorder %s565_s14, 3 }
   0x9   : > { %s122_s19 = sshll.u32 %s729_s1, 4  ;;  %s567_s21 = smov [#allocation5]   ;;  %s123_s19 = int_to_ptr.hbm [resolvable:$true] %s122_s19 }
   0xa   : > { %p625_p3 = pnand %p330_p0, %p111_p2  ;;  %s124_s22 = sshll.u32 %s567_s21, 4  ;;  %s125_s22 = int_to_ptr.vmem [resolvable:$true] %s124_s22 }
   0xb   : > { %p332_p6 = scmp.ge.s32.totalorder %s565_s14, 2  ;;  %s568_s23 = smov 128  }
   0xc   : > { %p352_p4 = pneg %p625_p3  ;;  %s569_s24 = smov 8  }
   0xd   : > { %s329_s25 = sadd.s32 4294967294, %s565_s14   ;;  %s31_s26 = sadd.s32 1, %s561_s13 }
   0xe   : > { %p353_p5 = pnand %p352_p4, %p617_p1  ;;  %s38_s27 = sadd.s32 1, %s553_s11 }
   0xf   : > { %p33_p7 = scmp.ge.s32.totalorder %s31_s26, 2  ;;  %p45_p8 = scmp.ne.s32.totalorder %s553_s11, %s549_s10 }
  0x10   : > { %355 = dma.hbm_to_vmem [thread:$0]  (!%p353_p5), %s123_s19, 512, %s125_s22, [#allocation6], %s568_s23, %s568_s23, %s569_s24  }
  0x11   : > { %p46_p9 = scmp.eq.s32.totalorder %s565_s14, 0  ;;  %p51_p10 = scmp.ne.s32.totalorder %s549_s10, %s545_s9 }
  0x12   : > { %s743_s26 = smov (%p33_p7, %s31_s26), 0  ;;  %p98_p13 = scmp.eq.s32.totalorder %s328_s15, 1 }
  0x13   : > { %p644_p11 = por %p46_p9, %p45_p8  ;;  %p650_p12 = por %p617_p1, %p51_p10 }
  0x14   : > { %s35_s30 = ssub.s32 %s561_s13, %s743_s26  ;;  %p104_p2 = scmp.eq.s32.totalorder %s329_s25, 1 }
  0x15   : > { %p36_p0 = scmp.eq.s32.totalorder %s35_s30, 0  ;;  %p656_p4 = por %p98_p13, %p45_p8 }
  0x16   : > { %p365_p5 = scmp.lt.s32.totalorder %s565_s14, 2  ;;  %p664_p7 = por %p104_p2, %p51_p10 }
  0x17   : > { %s662_s4 = scalar_select %p36_p0, %s553_s11, %s38_s27  }
  0x18   : > { %s138_s6 = sand.u32 1, %s553_s11   ;;  %s334_s8 = sshll.u32 %s561_s13, 3 }
  0x19   : > { %s333_s7 = sshll.u32 %s138_s6, 3  ;;  %s146_s15 = scalar_lea.hbm %s728_s0, %s334_s8 }
  0x1a   : > { %s142_s19 = scalar_lea.vmem [#allocation2], %s333_s7  ;;  %s148_s22 = sshll.u32 %s146_s15, 4  ;;  %s149_s22 = int_to_ptr.hbm [resolvable:$true] %s148_s22 }
  0x1b   : > { %s150_s21 = sshll.u32 %s142_s19, 4  ;;  %p357_p8 = pnand %p365_p5, %p644_p11  ;;  %s151_s21 = int_to_ptr.vmem [resolvable:$true] %s150_s21 }
  0x1c   : > { %s139_s23 = scalar_lea.sflag [#allocation3], %s138_s6  ;;  %159 = sbr.rel (%p625_p3) target bundleno = 173 (0xad), region = 28 }
  0x1d   : > { %359 = dma.hbm_to_vmem [thread:$0]  (!%p357_p8), %s149_s22, 128, %s151_s21, %s139_s23  }
  0x1e   : > { %s678_s24 = sand.u32 (!%p625_p3), 1, %s549_s10  }
  0x1f   : > { %s336_s25 = sshll.u32 (!%p625_p3), %s678_s24, 3  ;;  %s162_s27 = scalar_lea.sflag (!%p625_p3), [#allocation3], %s678_s24 }
  0x20   : > { %s165_s30 = scalar_lea.vmem (!%p625_p3), [#allocation2], %s336_s25 }
  0x21   : > { %532 = dma.done.wait (%p650_p12), %s162_s27, 128  }
  0x22   : > { %534 = vsyncadd (%p650_p12), %s162_s27, 4294967168 }
  0x23   : > { %536 = dma.done.wait (%p617_p1), [#allocation6], 512  }
  0x24   : > { %538 = vsyncadd (%p617_p1), [#allocation6], 4294966784  ;;  %v196_v0 = vld [vmem:[#allocation5 + $0x18] sm:$0xff]  ;;  %v195_v1 = vld [vmem:[#allocation5 + $0x10] sm:$0xff]  ;;  %vm197_vm0 = vcmask 261120   ;;  %s341_s20 = sshll.u32 %s557_s12, 3 }
  0x25   : > { %213 = vmatpush.msra.mxu0 %v196_v0  ;;  %v194_v2 = vld [vmem:[#allocation5 + $0x8] sm:$0xff]  ;;  %v193_v3 = vld [vmem:[#allocation5] sm:$0xff]  ;;  %v192_v4 = vld [vmem:[%s165_s30] sm:$0xff]  ;;  %s234_s16 = scalar_lea.hbm %s730_s2, %s341_s20  ;;  %s191_s6 = scalar_lea.vmem [#allocation7], %s336_s25 }
  0x26   : > { %s236_s7 = sshll.u32 %s191_s6, 4  ;;  %s238_s8 = sshll.u32 %s234_s16, 4  ;;  %s237_s7 = int_to_ptr.vmem [resolvable:$true] %s236_s7  ;;  %s239_s8 = int_to_ptr.hbm [resolvable:$true] %s238_s8 }
  0x27   : > { %214 = vmatpush.msra.mxu0 %v195_v1  ;;  %s223_s17 = scalar_lea.sflag [#allocation4], %s678_s24  ;;  %s493_s18 = sshra.s32 %s239_s8, 4  ;;  %s494_s18 = int_to_ptr.hbm [resolvable:$true] %s493_s18 }
  0x28   : > { %s495_s15 = scalar_lea.hbm %s494_s18, 8  ;;  %s499_s21 = scalar_lea.hbm %s730_s2, 16 }
  0x29   : > { %215 = vmatpush.msra.mxu0 %v194_v2  ;;  %p496_p1 = scmp.ne.s32.totalorder %s494_s18, %s495_s15  ;;  %p500_p10 = scmp.lt.s32.totalorder %s494_s18, %s730_s2 }
  0x2a   : > { %p501_p11 = scmp.lt.s32.totalorder %s499_s21, %s495_s15 }
  0x2b   : > { %216 = vmatpush.msra.mxu0 %v193_v3  ;;  %p497_p3 = pnand %p496_p1, %p656_p4 }
  0x2c   : > { %339 = vmatmul.msk.f32.vlgmr.msra.gmra.mxu0 %vm197_vm0, %v192_v4  ;;  %p502_p12 = por %p501_p11, %p500_p10 }
  0x2d   : > { %p498_p9 = pneg %p497_p3 }
  0x2f   : > { %p503_p13 = pnand %p502_p12, %p498_p9 }
  0xa9   : > { %v218_v5 = vpop.f32.mrf.mxu0 }
  0xaa   : > { %221 = vst [vmem:[%s191_s6] sm:$0xff] %v218_v5 }
  0xab   : > { %506 = shalt.err (!%p503_p13)
}
  0xac   : > { %350 = dma.vmem_to_hbm [thread:$0]  (%p656_p4), %s237_s7, 128, %s239_s8, %s223_s17  }
  0xad PF: > { %s250_s24 = sand.u32 1, %s545_s9   ;;  %p361_p0 = pnand %p332_p6, %p664_p7 }
  0xae   : > { %s251_s25 = scalar_lea.sflag [#allocation4], %s250_s24 }
  0xaf   : > { %p362_p2 = pneg %p361_p0 }
  0xb1   : > { %540 = dma.done.wait (%p362_p2), %s251_s25, 128  }
  0xb2   : > { %542 = vsyncadd (%p362_p2), %s251_s25, 4294967168  ;;  %s19_s14 = sadd.s32 1, %s565_s14   ;;  %s737_s9 = smov %s549_s10 }
  0xb3   : > { %p16_p5 = scmp.ge.s32.totalorder %s19_s14, 4   ;;  %s738_s10 = smov %s553_s11 }
  0xb4   : > { %s739_s11 = smov %s662_s4  ;;  %s740_s12 = smov %s561_s13 }
  0xb5   : > { %s741_s13 = smov %s743_s26  ;;  %18 = sbr.rel (!%p16_p5) target bundleno = 7 (0x7), region = 77 }
  0xba   :  { %257 = vsyncpa [#allocation3], 1 }
  0xbb   :  { %259 = vsyncpa [#allocation3 + $0x1], 1 }
  0xbc   :  { %260 = vsyncpa [#allocation6], 1 }
  0xbd   :  { %261 = vsyncpa [#allocation4], 1 }
  0xbe   :  { %263 = vsyncpa [#allocation4 + $0x1], 1 }

</bundles_post_ra>
